<compile_context>
chip_gen: v5e
topology: v5e:2x2
jax: 0.10.0
libtpu: 0.0.40
codegen_flags: <defaults>
</compile_context>

<pallas_src>
import functools

import jax
import jax.numpy as jnp
from jax import lax
from jax.experimental import pallas as pl
from jax.experimental.pallas import tpu as pltpu

N_CLUSTERS = 10
TEMPERATURE = 0.5
HIDDEN = 32


def _cluster_loss_kernel(c_ref, cp_ref, o_ref, *, inv_temperature):
    c = c_ref[...]            # (n, d), native dtype -> MXU operand
    cp = cp_ref[...]          # (n, d)

    # mat[i, j] = centers[i] . centers_prime[j]  -- NT dot_general, f32 accum,
    # no explicit transpose of cp.
    mat = lax.dot_general(
        c, cp,
        dimension_numbers=(((1,), (1,)), ((), ())),
        preferred_element_type=jnp.float32,
    )  # (n, n) f32

    # Diagonal via VPU row-wise dot (exact f32, overlaps with the MXU path).
    diag = jnp.sum(c.astype(jnp.float32) * cp.astype(jnp.float32),
                   axis=1, keepdims=True)  # (n, 1)

    n = mat.shape[0]

    # part_1 = -mean(diag(mat)) / temperature
    part_1 = -(jnp.sum(diag) / n) * inv_temperature

    # part_2 = mean(log(1 + sum_{j != i} exp(mat[i, j] / T)))
    # (sum over all columns, then subtract the diagonal term; relu dropped
    #  since the sum of exponentials is non-negative)
    mat_exp = jnp.exp(mat * inv_temperature)                       # (n, n)
    row_sums = jnp.sum(mat_exp, axis=1, keepdims=True)             # (n, 1)
    row_sums = row_sums - jnp.exp(diag * inv_temperature)          # drop diag
    part_2 = jnp.sum(jnp.log(1.0 + row_sums)) / n

    o_ref[0, 0] = part_1 + part_2


def cluster_loss(centers, centers_prime, temperature=TEMPERATURE):
    n, d = centers.shape
    assert centers_prime.shape == (n, d)
    out = pl.pallas_call(
        functools.partial(
            _cluster_loss_kernel, inv_temperature=1.0 / float(temperature)
        ),
        out_shape=jax.ShapeDtypeStruct((1, 1), jnp.float32),
        in_specs=[
            pl.BlockSpec((n, d), lambda: (0, 0)),
            pl.BlockSpec((n, d), lambda: (0, 0)),
        ],
        # Scalar reduction result -> SMEM (no padded VMEM tile / masked store).
        out_specs=pl.BlockSpec(memory_space=pltpu.MemorySpace.SMEM),
    )(centers, centers_prime)
    return out[0, 0]


def _reference(centers, centers_prime, temperature=TEMPERATURE):
    # Pure-JAX reference of the PyTorch forward, using the algebraic
    # identities diag(A @ B.T)[i] == sum_j A[i,j]*B[i,j] and
    # "zero the diagonal then row-sum" == "row-sum minus the diagonal term",
    # so the check is robust to the backend's default matmul precision.
    mat = centers @ centers_prime.T
    diag = jnp.sum(centers * centers_prime, axis=1, keepdims=True)
    part_1 = -jnp.mean(diag) / temperature
    row_sums = (jnp.sum(jnp.exp(mat / temperature), axis=1, keepdims=True)
                - jnp.exp(diag / temperature))
    part_2 = jnp.mean(jnp.log(1.0 + jax.nn.relu(row_sums)))
    return part_1 + part_2


if __name__ == "__main__":
    key = jax.random.PRNGKey(0)
    k1, k2 = jax.random.split(key)
    # small, deterministic inputs: (n_clusters=10, hidden=32), unit-norm rows
    centers = jax.random.normal(k1, (N_CLUSTERS, HIDDEN), dtype=jnp.float32)
    centers_prime = jax.random.normal(k2, (N_CLUSTERS, HIDDEN), dtype=jnp.float32)
    centers = centers / jnp.linalg.norm(centers, axis=1, keepdims=True)
    centers_prime = centers_prime / jnp.linalg.norm(centers_prime, axis=1, keepdims=True)

    loss = cluster_loss(centers, centers_prime)
    jax.block_until_ready(loss)

    ref = _reference(centers, centers_prime)
    # 1e-4 tolerance absorbs MXU accumulation-order / transcendental-ulp
    # differences between the Mosaic and XLA paths; loss magnitude is O(1).
    assert jnp.allclose(loss, ref, rtol=1e-4, atol=1e-4), (loss, ref)
    print("KERNEL_OK")
</pallas_src>

<mosaic_0001>
module attributes {stable_mosaic.version = 11 : i64} {
  func.func @_cluster_loss_kernel(%arg0: memref<10x32xf32, #tpu.memory_space<vmem>>, %arg1: memref<10x32xf32, #tpu.memory_space<vmem>>, %arg2: memref<1x1xf32, #tpu.memory_space<smem>>) attributes {dimension_semantics = [], scalar_prefetch = 0 : i64, scratch_operands = 0 : i64, tpu.core_type = #tpu.core_type<tc>} {
    %c0 = arith.constant 0 : index
    %c0_0 = arith.constant 0 : index
    %0 = vector.load %arg0[%c0, %c0_0] : memref<10x32xf32, #tpu.memory_space<vmem>>, vector<10x32xf32>
    %c0_1 = arith.constant 0 : index
    %c0_2 = arith.constant 0 : index
    %1 = vector.load %arg1[%c0_1, %c0_2] : memref<10x32xf32, #tpu.memory_space<vmem>>, vector<10x32xf32>
    %cst = arith.constant dense<0.000000e+00> : vector<10x10xf32>
    %2 = tpu.matmul %0, %1, %cst {dimension_numbers = #tpu.dot_dimension_numbers<[1], [1], [0], [0], [0, 0, 1, 0], [], []>} : vector<10x32xf32>, vector<10x32xf32>, vector<10x10xf32> -> vector<10x10xf32>
    %3 = arith.mulf %0, %1 : vector<10x32xf32>
    %cst_3 = arith.constant dense<0.000000e+00> : vector<10xf32>
    %4 = vector.multi_reduction <add>, %3, %cst_3 [1] : vector<10x32xf32> to vector<10xf32>
    %5 = vector.shape_cast %4 : vector<10xf32> to vector<10x1xf32>
    %6 = vector.shape_cast %5 : vector<10x1xf32> to vector<1x10x1xf32>
    %cst_4 = arith.constant dense<0.000000e+00> : vector<1xf32>
    %7 = vector.multi_reduction <add>, %6, %cst_4 [1, 2] : vector<1x10x1xf32> to vector<1xf32>
    %8 = vector.shape_cast %7 : vector<1xf32> to vector<1x1x1xf32>
    %9 = vector.extract %8[0, 0, 0] : f32 from vector<1x1x1xf32>
    %cst_5 = arith.constant 1.000000e+01 : f32
    %10 = arith.divf %9, %cst_5 : f32
    %cst_6 = arith.constant 0.000000e+00 : f32
    %11 = arith.subf %cst_6, %10 : f32
    %cst_7 = arith.constant 2.000000e+00 : f32
    %12 = arith.mulf %11, %cst_7 : f32
    %cst_8 = arith.constant 2.000000e+00 : f32
    %13 = vector.broadcast %cst_8 : f32 to vector<10x10xf32>
    %14 = arith.mulf %2, %13 : vector<10x10xf32>
    %15 = math.exp %14 : vector<10x10xf32>
    %cst_9 = arith.constant dense<0.000000e+00> : vector<10xf32>
    %16 = vector.multi_reduction <add>, %15, %cst_9 [1] : vector<10x10xf32> to vector<10xf32>
    %17 = vector.shape_cast %16 : vector<10xf32> to vector<10x1xf32>
    %cst_10 = arith.constant 2.000000e+00 : f32
    %18 = vector.broadcast %cst_10 : f32 to vector<10x1xf32>
    %19 = arith.mulf %5, %18 : vector<10x1xf32>
    %20 = math.exp %19 : vector<10x1xf32>
    %21 = arith.subf %17, %20 : vector<10x1xf32>
    %cst_11 = arith.constant 1.000000e+00 : f32
    %22 = vector.broadcast %cst_11 : f32 to vector<10x1xf32>
    %23 = arith.addf %22, %21 : vector<10x1xf32>
    %24 = math.log %23 : vector<10x1xf32>
    %25 = vector.shape_cast %24 : vector<10x1xf32> to vector<1x10x1xf32>
    %cst_12 = arith.constant dense<0.000000e+00> : vector<1xf32>
    %26 = vector.multi_reduction <add>, %25, %cst_12 [1, 2] : vector<1x10x1xf32> to vector<1xf32>
    %27 = vector.shape_cast %26 : vector<1xf32> to vector<1x1x1xf32>
    %28 = vector.extract %27[0, 0, 0] : f32 from vector<1x1x1xf32>
    %cst_13 = arith.constant 1.000000e+01 : f32
    %29 = arith.divf %28, %cst_13 : f32
    %30 = arith.addf %12, %29 : f32
    %c0_14 = arith.constant 0 : index
    %c0_15 = arith.constant 0 : index
    %31 = memref.load %arg2[%c0_14, %c0_15] : memref<1x1xf32, #tpu.memory_space<smem>>
    memref.store %30, %arg2[%c0_14, %c0_15] : memref<1x1xf32, #tpu.memory_space<smem>>
    return
  }
}

</mosaic_0001>

<bundles_post_ra>
// kernel: tpu_custom_call.1
= control target key start
LH: loop header
LB: loop body
LE: loop exit
PB: predicated region body
PF: predicated region fallthrough
CT: control target
= control target key end

     0   :  { %7 = vsyncpa [#allocation3], 0  ;;  %s319_s0 = inlined_call_operand.hbm [shape: f32[10,32], index: 0, kind: input, shape index: {}]   ;;  %s320_s1 = inlined_call_operand.hbm [shape: f32[10,32], index: 1, kind: input, shape index: {}]   ;;  %s321_s2 = inlined_call_operand.hbm [shape: f32[1,1], index: 2, kind: output, shape index: {}]  }
   0x1   :  { %8 = vsyncpa [#allocation6], 0 }
   0x2   :  { %9 = vsyncpa [#allocation4], 0  ;;  %s14_s11 = sshll.u32 %s319_s0, 4  ;;  %s285_s12 = smov [#allocation2]   ;;  %s15_s11 = int_to_ptr.hbm [resolvable:$true] %s14_s11 }
   0x3   :  { %s16_s13 = sshll.u32 %s285_s12, 4  ;;  %s27_s16 = sshll.u32 %s320_s1, 4  ;;  %s17_s13 = int_to_ptr.vmem [resolvable:$true] %s16_s13  ;;  %s28_s16 = int_to_ptr.hbm [resolvable:$true] %s27_s16 }
   0x4   :  { %s286_s17 = smov 128   ;;  %s287_s18 = smov 8  }
   0x5   :  { %22 = dma.hbm_to_vmem [thread:$0]  %s15_s11, 256, %s17_s13, [#allocation3], %s286_s17, %s286_s17, %s287_s18  }
   0x6   :  { %s288_s19 = smov [#allocation5]  }
   0x7   :  { %s29_s20 = sshll.u32 %s288_s19, 4  ;;  %s30_s20 = int_to_ptr.vmem [resolvable:$true] %s29_s20 }
   0x8   :  { %35 = dma.hbm_to_vmem [thread:$0]  %s28_s16, 256, %s30_s20, [#allocation6], %s286_s17, %s286_s17, %s287_s18  }
   0x9   :  { %279 = dma.done.wait [#allocation3], 256  }
   0xa   :  { %280 = vsyncadd [#allocation3], 4294967040 }
   0xb   :  { %281 = dma.done.wait [#allocation6], 256  }
   0xc   :  { %282 = vsyncadd [#allocation6], 4294967040  ;;  %vm48_vm0 = vcmask 261120   ;;  %v47_v0 = vld [vmem:[#allocation5 + $0x8] sm:$0x3]  ;;  %v46_v1 = vld [vmem:[#allocation5] sm:$0xff] }
   0xd   :  { %v44_v2 = vld [vmem:[#allocation2] sm:$0xff]  ;;  %187 = vmatpush.xpose.msk.msra.mxu0 %vm48_vm0, %v47_v0  ;;  %191 = vmatpush.xpose.msk.msra.mxu1 %vm48_vm0, %v47_v0  ;;  %v45_v5 = vld [vmem:[#allocation2 + $0x8] sm:$0x3]  ;;  %vm89_vm1 = vcmask 254976   ;;  %vm93_vm2 = vcmask 7168   ;;  %vm95_vm3 = vcmask 1024  }
   0xe   :  { %v84_v3 = vmul.f32 %v46_v1, %v44_v2  ;;  %v85_v6 = vmul.f32 %v47_v0, %v45_v5  ;;  %vm124_vm4 = vcmask 80896   ;;  %vm128_vm5 = vcmask 74752   ;;  %s175_s25 = sshll.u32 %s321_s2, 4  ;;  %s290_s30 = smov [#allocation7]   ;;  %s176_s25 = int_to_ptr.hbm [resolvable:$true] %s175_s25 }
   0xf   :  { %v289_v28 = vmov 10.0  }
  0x10   :  { %v86_v4 = vsel %vm48_vm0, %v84_v3, 0.0  ;;  %v90_v7 = vsel %vm89_vm1, %v85_v6, 0.0 }
  0x11   :  { %87 = vadd.xlane.f32.xlu0 %v86_v4  ;;  %188 = vmatpush.xpose.msk.msra.mxu0 %vm48_vm0, %v46_v1 }
  0x12   :  { %192 = vmatpush.xpose.msk.msra.mxu1 %vm48_vm0, %v46_v1 }
  0x14   :  { %189 = vmatmul.msk.f32.vlgmr.msra.gmra.mxu0 %vm48_vm0, %v44_v2 }
  0x15   :  { %190 = vmatmul.msk.f32.vlgmr.msra.gmra.mxu1 %vm48_vm0, %v45_v5 }
  0x19   :  { %91 = vadd.xlane.f32.xlu0 %v90_v7 }
  0x84   :  { %v88_v8 = vpop.xlane.xlu0 %87 }
  0x85   :  { %v94_v9 = vsel %vm93_vm2, %v88_v8, 0.0  ;;  %v132_v23 = vmul.f32 2.0, %v88_v8 }
  0x87   :  { %v134_v24 = vmul.f32 1.442695, %v132_v23 }
  0x8c   :  { %v92_v10 = vpop.xlane.xlu0 %91 }
  0x8d   :  { %v96_v11 = vsel %vm95_vm3, %v92_v10, 0.0  ;;  %v133_v25 = vmul.f32 2.0, %v92_v10 }
  0x8e   :  { %v97_v12 = vadd.f32 %v96_v11, %v94_v9 }
  0x8f   :  { %v136_v29 = vmul.f32 1.442695, %v133_v25 }
  0x90   :  { %98 = vadd.xlane.f32.xlu2 %v97_v12 }
  0x91   :  { %v78_v13 = vpop.f32.mrf.mxu0 }
  0x92   :  { %v81_v14 = vpop.f32.mrf.mxu1  ;;  %v118_v15 = vmul.f32 2.0, %v78_v13 }
  0x93   :  { %v119_v16 = vmul.f32 2.0, %v81_v14 }
  0x94   :  { %v120_v17 = vmul.f32 1.442695, %v118_v15 }
  0x95   :  { %v122_v18 = vmul.f32 1.442695, %v119_v16 }
  0x96   :  { %205 = vpow2.f32 %v120_v17 }
  0x97   :  { %207 = vpow2.f32 %v122_v18 }
  0x98   :  { %209 = vpow2.f32 %v134_v24 }
  0x99   :  { %211 = vrcp.f32 %v289_v28 }
  0x9a   :  { %213 = vpow2.f32 %v136_v29 }
  0x9c   :  { %v206_v19 = vpop.eup %205 }
  0x9d   :  { %v125_v20 = vsel %vm124_vm4, %v206_v19, 0.0  ;;  %v208_v21 = vpop.eup %207 }
  0x9e   :  { %126 = vadd.xlane.f32.xlu1 %v125_v20  ;;  %v129_v22 = vsel %vm128_vm5, %v208_v21, 0.0  ;;  %v210_v31 = vpop.eup %209 }
  0x9f   :  { %v212_v33 = vpop.eup %211 }
  0xa0   :  { %v108_v37 = vmul.f32 10.0, %v212_v33  ;;  %v214_v43 = vpop.eup %213  ;;  %vm112_vm6 = vweird.f32 %v212_v33 }
  0xa2   :  { %v109_v39 = vsub.f32 1.0, %v108_v37 }
  0xa4   :  { %v110_v42 = vmul.f32 %v212_v33, %v109_v39 }
  0xa6   :  { %130 = vadd.xlane.f32.xlu1 %v129_v22  ;;  %v111_v44 = vadd.f32 %v212_v33, %v110_v42 }
  0xa8   :  { %v113_v47 = vsel %vm112_vm6, %v212_v33, %v111_v44 }
 0x103   :  { %v99_v26 = vpop.xlane.xlu2 %98 }
 0x104   :  { %v100_v27 = vrot.slane %v99_v26, 4 }
 0x106   :  { %v101_v30 = vadd.f32 %v100_v27, %v99_v26 }
 0x108   :  { %v102_v32 = vrot.slane %v101_v30, 2 }
 0x10a   :  { %v103_v35 = vadd.f32 %v102_v32, %v101_v30 }
 0x10c   :  { %v104_v38 = vrot.slane %v103_v35, 1 }
 0x10e   :  { %v105_v40 = vadd.f32 %v104_v38, %v103_v35 }
 0x110   :  { %193 = vpush %v105_v40 }
 0x111   :  { %v127_v34 = vpop.xlane.xlu1 %126  ;;  %195 = vpush %v113_v47 }
 0x112   :  { %v138_v36 = vsub.f32 %v127_v34, %v210_v31 }
 0x114   :  { %v140_v41 = vadd.f32 1.0, %v138_v36 }
 0x116   :  { %215 = vlog2.f32 %v140_v41 }
 0x119   :  { %v131_v45 = vpop.xlane.xlu1 %130 }
 0x11a   :  { %v139_v46 = vsub.f32 %v131_v45, %v214_v43 }
 0x11c   :  { %v141_v48 = vadd.f32 1.0, %v139_v46  ;;  %v216_v49 = vpop.eup %215 }
 0x11d   :  { %v143_v50 = vmul.f32 0.6931472, %v216_v49 }
 0x11e   :  { %217 = vlog2.f32 %v141_v48 }
 0x11f   :  { %v146_v53 = vsel %vm93_vm2, %v143_v50, 0.0 }
 0x124   :  { %v218_v51 = vpop.eup %217 }
 0x125   :  { %v145_v52 = vmul.f32 0.6931472, %v218_v51 }
 0x127   :  { %v147_v54 = vsel %vm95_vm3, %v145_v52, 0.0 }
 0x128   :  { %v148_v55 = vadd.f32 %v147_v54, %v146_v53 }
 0x12a   :  { %149 = vadd.xlane.f32.xlu2 %v148_v55 }
 0x141   :  { %s194_s0 = spop %193 }
 0x142   :  { %s196_s1 = spop %195 }
 0x143   :  { %s115_s21 = smul.f32 %s196_s1, %s194_s0 }
 0x145   :  { %s116_s22 = ssub.f32 0.0, %s115_s21 }
 0x147   :  { %s117_s26 = smul.f32 2.0, %s116_s22 }
 0x19d   :  { %v150_v56 = vpop.xlane.xlu2 %149 }
 0x19e   :  { %v151_v57 = vrot.slane %v150_v56, 4 }
 0x1a0   :  { %v152_v58 = vadd.f32 %v151_v57, %v150_v56 }
 0x1a2   :  { %v153_v59 = vrot.slane %v152_v58, 2 }
 0x1a4   :  { %v154_v60 = vadd.f32 %v153_v59, %v152_v58 }
 0x1a6   :  { %v155_v61 = vrot.slane %v154_v60, 1 }
 0x1a8   :  { %v156_v62 = vadd.f32 %v155_v61, %v154_v60 }
 0x1aa   :  { %197 = vpush %v156_v62 }
 0x1db   :  { %s198_s27 = spop %197 }
 0x1dc   :  { %s166_s28 = smul.f32 %s198_s27, %s196_s1 }
 0x1de   :  { %s167_s29 = sadd.f32 %s166_s28, %s117_s26 }
 0x1e0   :  { %169 = sst [smem:[#allocation7]] %s167_s29 }
 0x1e1   :  { %178 = dma.smem_to_hbm %s290_s30, 16, %s176_s25, [#allocation4]  }
 0x1e2   :  { %283 = dma.done.wait [#allocation4], 16  }
 0x1e3   :  { %284 = vsyncadd [#allocation4], 4294967280 }
 0x1e4   :  { %183 = sfence }
 0x1e5   :  { %184 = vsyncpa [#allocation3], 1 }
 0x1e6   :  { %185 = vsyncpa [#allocation6], 1 }
 0x1e7   :  { %186 = vsyncpa [#allocation4], 1 }

</bundles_post_ra>
